<compile_context>
chip_gen: v7x
topology: tpu7x:2x2x1
jax: 0.10.0
libtpu: 0.0.40
codegen_flags: <defaults>
</compile_context>

<pallas_src>
import functools

import jax
import jax.numpy as jnp
from jax.experimental import pallas as pl
from jax.experimental.pallas import tpu as pltpu


_NEG_SLOPE = 0.01
_HEAD_PAD = 128   # lane-dense output slab: cols 0..6 action scores (2,5 softplus'd), col 7 value
_BTILE = 8        # batch tile: multiple of 8 -> (8,128)-aligned output tiles


def _round_up(n, m):
    return ((n + m - 1) // m) * m


def _leaky(x, ns=_NEG_SLOPE):
    return jnp.where(x >= 0, x, ns * x)


# ---------------------------------------------------------------------------
# Fused Pallas kernel
# ---------------------------------------------------------------------------
def _make_fused_kernel(mc):
    def kernel(patch_ref, outer_ref, pool_ref,
               cw_ref, cb_ref, w1f_ref, w1o_ref, b1_ref,
               w2_ref, b2_ref, wh_ref, bh_ref, o_ref):
        # Merged conv (map+struct branches, action+value bases): [Bt*P, K] @ [K, F]
        conv = jnp.dot(patch_ref[...], cw_ref[...],
                       preferred_element_type=jnp.float32)
        conv = _leaky(conv + cb_ref[...])
        # Spatial mean-pool as a pooling-matrix matmul (MXU has slack; keeps
        # the XLU/VALU slots free).  pool already contains the 1/P factor.
        feat = jnp.dot(pool_ref[...], conv, preferred_element_type=jnp.float32)
        # fc1: pooled features on the MXU; outer_prob_mass (K = mc, tiny) as
        # broadcasted VPU FMAs instead of an MXU dot.
        h = jnp.dot(feat, w1f_ref[...], preferred_element_type=jnp.float32)
        h = h + b1_ref[...]
        outer = outer_ref[...]
        w1o = w1o_ref[...]
        for c in range(mc):
            h = h + outer[:, c:c + 1] * w1o[c:c + 1, :]
        h = _leaky(h)
        h = _leaky(jnp.dot(h, w2_ref[...], preferred_element_type=jnp.float32)
                   + b2_ref[...])
        out = jnp.dot(h, wh_ref[...], preferred_element_type=jnp.float32) + bh_ref[...]
        # In-kernel epilogue: stable softplus (EUP) on the std columns 2 and 5.
        lane = jax.lax.broadcasted_iota(jnp.int32, out.shape, 1)
        softplus = jnp.maximum(out, 0.0) + jnp.log(1.0 + jnp.exp(-jnp.abs(out)))
        o_ref[...] = jnp.where((lane == 2) | (lane == 5), softplus, out)

    return kernel


def _fused_call(patches, outer, params, *, Bpad, Btile, P):
    K = patches.shape[1]
    mc = outer.shape[1]
    kernel = _make_fused_kernel(mc)
    resident = (params["pool"], params["cw"], params["cb"], params["w1f"],
                params["w1o"], params["b1"], params["w2"], params["b2"],
                params["wh"], params["bh"])
    in_specs = (
        [pl.BlockSpec((Btile * P, K), lambda i: (i, 0)),    # patch tile (pipelined)
         pl.BlockSpec((Btile, mc), lambda i: (i, 0))]       # outer_prob_mass tile
        + [pl.BlockSpec(r.shape, lambda i: (0, 0)) for r in resident])  # resident weights
    return pl.pallas_call(
        kernel,
        grid=(Bpad // Btile,),
        out_shape=jax.ShapeDtypeStruct((Bpad, _HEAD_PAD), jnp.float32),
        in_specs=in_specs,
        out_specs=pl.BlockSpec((Btile, _HEAD_PAD), lambda i: (i, 0)),
        compiler_params=pltpu.CompilerParams(
            dimension_semantics=("parallel",),
            vmem_limit_bytes=32 * 1024 * 1024),
    )(patches, outer, *resident)


# ---------------------------------------------------------------------------
# JAX glue (outside the kernel)
# ---------------------------------------------------------------------------
def _center_crop(x, crop):
    h = x.shape[2]
    c0 = (h - crop) // 2
    return x[:, :, c0:c0 + crop, c0:c0 + crop]


def _extract_patches(x, k, stride, pad):
    """NCHW -> matmul-ready [B*OH*OW, C*k*k] patches via a single XLA op.
    Feature lanes are channel-major (c, kh, kw) — self-consistent with the
    synthetic conv weight packing."""
    B, C, H, W = x.shape
    p = jax.lax.conv_general_dilated_patches(
        x, filter_shape=(k, k), window_strides=(stride, stride),
        padding=((pad, pad), (pad, pad)))            # [B, C*k*k, OH, OW]
    _, K, OH, OW = p.shape
    p = p.transpose(0, 2, 3, 1).reshape(B * OH * OW, K)
    return p, OH * OW


def _forward_fn(params, v_dist_inner, v_dist_outer, map_structure_r, *,
                crop_size, use_struct, Btile):
    B = v_dist_inner.shape[0]
    Bpad = _round_up(B, Btile)
    inner_c = _center_crop(v_dist_inner.astype(jnp.float32), crop_size)
    if use_struct:
        struct_c = _center_crop(map_structure_r.astype(jnp.float32), crop_size)
        x = jnp.concatenate([inner_c, struct_c], axis=1)
    else:
        x = inner_c
    outer = v_dist_outer.astype(jnp.float32)
    if Bpad > B:
        x = jnp.pad(x, ((0, Bpad - B), (0, 0), (0, 0), (0, 0)))
        outer = jnp.pad(outer, ((0, Bpad - B), (0, 0)))
    patches, P = _extract_patches(x, 3, 2, 1)        # [Bpad*P, K] (unpadded lanes)
    assert params["pool"].shape == (Btile, Btile * P)

    out = _fused_call(patches, outer, params, Bpad=Bpad, Btile=Btile, P=P)
    out = out[:B]
    xvel_mean = out[:, 0]
    xvel_std = out[:, 2]        # softplus already applied in-kernel
    yawrate_mean = out[:, 3]
    yawrate_std = out[:, 5]     # softplus already applied in-kernel
    stop_logits = out[:, 6]
    value_pred = out[:, 7:8]
    return xvel_mean, xvel_std, yawrate_mean, yawrate_std, stop_logits, value_pred


# ---------------------------------------------------------------------------
# Model (deterministic synthetic parameters packed for the fused kernel)
# ---------------------------------------------------------------------------
class PVNStage2ActorCriticPallas:
    def __init__(self, key, *, map_channels, map_struct_channels, map_size,
                 crop_size, h1, h2, structure_h1, obs_dim, ignore_struct=False):
        del map_size, obs_dim  # TODO(synk): pose/obs input not in this forward path
        self.crop_size = crop_size
        self.use_struct = not ignore_struct
        mc, msc, sh1 = map_channels, map_struct_channels, structure_h1
        k = 3
        oh = (crop_size + 2 * 1 - k) // 2 + 1
        self.P = oh * oh
        f32 = jnp.float32

        k_act, k_val, k_ah, k_vh = jax.random.split(key, 4)
        a = self._init_base(k_act, mc, msc, h1, sh1, h2, k)
        v = self._init_base(k_val, mc, msc, h1, sh1, h2, k)
        ah_w = self._w(k_ah, (h2, 7), h2)
        vh_w = self._w(k_vh, (h2, 1), h2)

        km, kst = mc * k * k, msc * k * k
        F = 2 * h1 + (2 * sh1 if self.use_struct else 0)
        K = km + (kst if self.use_struct else 0)

        # Merged conv weight: rows = [map patch lanes, struct patch lanes],
        # cols = [action h1 | value h1 | action sh1 | value sh1].
        cw = jnp.zeros((K, F), f32)
        cw = cw.at[:km, :h1].set(a["conv_w"]).at[:km, h1:2 * h1].set(v["conv_w"])
        cb = jnp.concatenate([a["conv_b"], v["conv_b"]], axis=1)
        if self.use_struct:
            cw = (cw.at[km:, 2 * h1:2 * h1 + sh1].set(a["sconv_w"])
                    .at[km:, 2 * h1 + sh1:].set(v["sconv_w"]))
            cb = jnp.concatenate([cb, a["sconv_b"], v["sconv_b"]], axis=1)

        # fc1 split by feature group; block-diagonal across the two bases.
        w1f = jnp.zeros((F, 2 * h2), f32)
        w1f = (w1f.at[:h1, :h2].set(a["fc1_w"][:h1])
                  .at[h1:2 * h1, h2:].set(v["fc1_w"][:h1]))
        w1_str = jnp.zeros((2 * sh1, 2 * h2), f32)
        w1_str = (w1_str.at[:sh1, :h2].set(a["fc1_w"][h1:h1 + sh1])
                        .at[sh1:, h2:].set(v["fc1_w"][h1:h1 + sh1]))
        if self.use_struct:
            w1f = w1f.at[2 * h1:, :].set(w1_str)
        w1o = jnp.zeros((mc, 2 * h2), f32)
        w1o = (w1o.at[:, :h2].set(a["fc1_w"][h1 + sh1:])
                  .at[:, h2:].set(v["fc1_w"][h1 + sh1:]))
        b1 = jnp.concatenate([a["fc1_b"], v["fc1_b"]], axis=1)
        if not self.use_struct:
            # ignore_structured_input: conv over an all-zero map == leaky(bias),
            # a constant feature -> fold its fc1 contribution into b1 at init.
            sb = jnp.concatenate([a["sconv_b"], v["sconv_b"]], axis=1)
            b1 = b1 + _leaky(sb) @ w1_str

        w2 = jnp.zeros((2 * h2, 2 * h2), f32)
        w2 = w2.at[:h2, :h2].set(a["fc2_w"]).at[h2:, h2:].set(v["fc2_w"])
        b2 = jnp.concatenate([a["fc2_b"], v["fc2_b"]], axis=1)

        # Combined head: cols 0..6 action scores, col 7 value, rest lane pad.
        wh = jnp.zeros((2 * h2, _HEAD_PAD), f32)
        wh = wh.at[:h2, :7].set(ah_w).at[h2:, 7:8].set(vh_w)
        bh = jnp.zeros((1, _HEAD_PAD), f32)

        # Pooling matrix (includes the 1/P mean factor); resident in VMEM.
        pool = (jnp.arange(_BTILE * self.P) // self.P
                == jnp.arange(_BTILE)[:, None]).astype(f32) / float(self.P)

        self.params = dict(cw=cw, cb=cb, w1f=w1f, w1o=w1o, b1=b1,
                           w2=w2, b2=b2, wh=wh, bh=bh, pool=pool)

        self._fwd = jax.jit(functools.partial(
            _forward_fn, crop_size=crop_size, use_struct=self.use_struct,
            Btile=_BTILE))

    @staticmethod
    def _w(key, shape, fan_in):
        return (jax.random.normal(key, shape, jnp.float32)
                / jnp.sqrt(jnp.float32(fan_in)))

    def _init_base(self, key, mc, msc, h1, sh1, h2, k=3):
        ks = jax.random.split(key, 4)
        feat_dim = h1 + sh1 + mc
        return dict(
            conv_w=self._w(ks[0], (mc * k * k, h1), mc * k * k),
            conv_b=jnp.zeros((1, h1), jnp.float32),
            sconv_w=self._w(ks[1], (msc * k * k, sh1), msc * k * k),
            sconv_b=jnp.zeros((1, sh1), jnp.float32),
            fc1_w=self._w(ks[2], (feat_dim, h2), feat_dim),
            fc1_b=jnp.zeros((1, h2), jnp.float32),
            fc2_w=self._w(ks[3], (h2, h2), h2),
            fc2_b=jnp.zeros((1, h2), jnp.float32),
        )

    def __call__(self, v_dist_inner, v_dist_outer, map_structure_r):
        """v_dist_inner: [B, Cmap, S, S], v_dist_outer: [B, Cmap],
        map_structure_r: [B, Cstruct, S, S] (NCHW / f32)."""
        (xvel_mean, xvel_std, yawrate_mean, yawrate_std,
         stop_logits, value_pred) = self._fwd(
            self.params, v_dist_inner, v_dist_outer, map_structure_r)
        xvel_dist = {"mean": xvel_mean, "std": xvel_std}            # FixedNormal params
        yawrate_dist = {"mean": yawrate_mean, "std": yawrate_std}   # FixedNormal params
        stop_dist = {"logits": stop_logits}                         # FixedBernoulli params
        return xvel_dist, yawrate_dist, stop_dist, value_pred


# ---------------------------------------------------------------------------
# Demo
# ---------------------------------------------------------------------------
if __name__ == "__main__":
    key = jax.random.PRNGKey(0)
    k_in, k_out, k_str, k_param = jax.random.split(key, 4)

    B = 2
    cfg = dict(
        map_channels=2, map_struct_channels=2, map_size=32, crop_size=16,
        h1=16, h2=32, structure_h1=8, obs_dim=16,
    )

    S = cfg["map_size"]
    # inner visitation distribution: softmax over spatial positions per channel
    inner = jax.random.normal(k_in, (B, cfg["map_channels"], S, S), jnp.float32)
    inner = jax.nn.softmax(inner.reshape(B, cfg["map_channels"], -1), axis=-1)
    inner = inner.reshape(B, cfg["map_channels"], S, S)
    outer = jax.random.uniform(k_out, (B, cfg["map_channels"]), jnp.float32)
    map_structure_r = jax.random.normal(
        k_str, (B, cfg["map_struct_channels"], S, S), jnp.float32)

    model = PVNStage2ActorCriticPallas(k_param, **cfg)
    xvel_dist, yawrate_dist, stop_dist, value_pred = model(
        inner, outer, map_structure_r)

    jax.block_until_ready((xvel_dist, yawrate_dist, stop_dist, value_pred))
    assert value_pred.shape == (B, 1)
    assert xvel_dist["mean"].shape == (B,)
    assert xvel_dist["std"].shape == (B,)
    assert yawrate_dist["std"].shape == (B,)
    assert stop_dist["logits"].shape == (B,)
    print("KERNEL_OK")
</pallas_src>

<mosaic_0001>
module attributes {stable_mosaic.version = 11 : i64} {
  func.func @kernel(%arg0: i32, %arg1: memref<512x36xf32, #tpu.memory_space<vmem>>, %arg2: memref<8x2xf32, #tpu.memory_space<vmem>>, %arg3: memref<8x512xf32, #tpu.memory_space<vmem>>, %arg4: memref<36x48xf32, #tpu.memory_space<vmem>>, %arg5: memref<1x48xf32, #tpu.memory_space<vmem>>, %arg6: memref<48x64xf32, #tpu.memory_space<vmem>>, %arg7: memref<2x64xf32, #tpu.memory_space<vmem>>, %arg8: memref<1x64xf32, #tpu.memory_space<vmem>>, %arg9: memref<64x64xf32, #tpu.memory_space<vmem>>, %arg10: memref<1x64xf32, #tpu.memory_space<vmem>>, %arg11: memref<64x128xf32, #tpu.memory_space<vmem>>, %arg12: memref<1x128xf32, #tpu.memory_space<vmem>>, %arg13: memref<8x128xf32, #tpu.memory_space<vmem>>) attributes {dimension_semantics = [#tpu.dimension_semantics<parallel>], iteration_bounds = array<i64: 1>, scalar_prefetch = 0 : i64, scratch_operands = 0 : i64, tpu.core_type = #tpu.core_type<tc>, window_params = [{transform_indices = @transform_0, window_bounds = array<i64: 512, 36>}, {transform_indices = @transform_1, window_bounds = array<i64: 8, 2>}, {pipeline_mode = #tpu.pipeline_mode<synchronous>, transform_indices = @transform_2, window_bounds = array<i64: 8, 512>}, {pipeline_mode = #tpu.pipeline_mode<synchronous>, transform_indices = @transform_3, window_bounds = array<i64: 36, 48>}, {pipeline_mode = #tpu.pipeline_mode<synchronous>, transform_indices = @transform_4, window_bounds = array<i64: 1, 48>}, {pipeline_mode = #tpu.pipeline_mode<synchronous>, transform_indices = @transform_5, window_bounds = array<i64: 48, 64>}, {pipeline_mode = #tpu.pipeline_mode<synchronous>, transform_indices = @transform_6, window_bounds = array<i64: 2, 64>}, {pipeline_mode = #tpu.pipeline_mode<synchronous>, transform_indices = @transform_7, window_bounds = array<i64: 1, 64>}, {pipeline_mode = #tpu.pipeline_mode<synchronous>, transform_indices = @transform_8, window_bounds = array<i64: 64, 64>}, {pipeline_mode = #tpu.pipeline_mode<synchronous>, transform_indices = @transform_9, window_bounds = array<i64: 1, 64>}, {pipeline_mode = #tpu.pipeline_mode<synchronous>, transform_indices = @transform_10, window_bounds = array<i64: 64, 128>}, {pipeline_mode = #tpu.pipeline_mode<synchronous>, transform_indices = @transform_11, window_bounds = array<i64: 1, 128>}, {transform_indices = @transform_12, window_bounds = array<i64: 8, 128>}]} {
    %c0 = arith.constant 0 : index
    %c0_0 = arith.constant 0 : index
    %0 = vector.load %arg1[%c0, %c0_0] : memref<512x36xf32, #tpu.memory_space<vmem>>, vector<512x36xf32>
    %c0_1 = arith.constant 0 : index
    %c0_2 = arith.constant 0 : index
    %1 = vector.load %arg4[%c0_1, %c0_2] : memref<36x48xf32, #tpu.memory_space<vmem>>, vector<36x48xf32>
    %cst = arith.constant dense<0.000000e+00> : vector<512x48xf32>
    %2 = tpu.matmul %0, %1, %cst {dimension_numbers = #tpu.dot_dimension_numbers<[1], [0], [0], [1], [0, 0, 1, 1], [], []>} : vector<512x36xf32>, vector<36x48xf32>, vector<512x48xf32> -> vector<512x48xf32>
    %c0_3 = arith.constant 0 : index
    %c0_4 = arith.constant 0 : index
    %3 = vector.load %arg5[%c0_3, %c0_4] : memref<1x48xf32, #tpu.memory_space<vmem>>, vector<1x48xf32>
    %4 = vector.broadcast %3 : vector<1x48xf32> to vector<512x48xf32>
    %5 = arith.addf %2, %4 : vector<512x48xf32>
    %cst_5 = arith.constant 0.000000e+00 : f32
    %6 = vector.broadcast %cst_5 : f32 to vector<512x48xf32>
    %7 = arith.cmpf oge, %5, %6 : vector<512x48xf32>
    %cst_6 = arith.constant 0.00999999977 : f32
    %8 = vector.broadcast %cst_6 : f32 to vector<512x48xf32>
    %9 = arith.mulf %8, %5 : vector<512x48xf32>
    %10 = arith.select %7, %5, %9 : vector<512x48xi1>, vector<512x48xf32>
    %c0_7 = arith.constant 0 : index
    %c0_8 = arith.constant 0 : index
    %11 = vector.load %arg3[%c0_7, %c0_8] : memref<8x512xf32, #tpu.memory_space<vmem>>, vector<8x512xf32>
    %cst_9 = arith.constant dense<0.000000e+00> : vector<8x48xf32>
    %12 = tpu.matmul %11, %10, %cst_9 {dimension_numbers = #tpu.dot_dimension_numbers<[1], [0], [0], [1], [0, 0, 1, 1], [], []>} : vector<8x512xf32>, vector<512x48xf32>, vector<8x48xf32> -> vector<8x48xf32>
    %c0_10 = arith.constant 0 : index
    %c0_11 = arith.constant 0 : index
    %13 = vector.load %arg6[%c0_10, %c0_11] : memref<48x64xf32, #tpu.memory_space<vmem>>, vector<48x64xf32>
    %cst_12 = arith.constant dense<0.000000e+00> : vector<8x64xf32>
    %14 = tpu.matmul %12, %13, %cst_12 {dimension_numbers = #tpu.dot_dimension_numbers<[1], [0], [0], [1], [0, 0, 1, 1], [], []>} : vector<8x48xf32>, vector<48x64xf32>, vector<8x64xf32> -> vector<8x64xf32>
    %c0_13 = arith.constant 0 : index
    %c0_14 = arith.constant 0 : index
    %15 = vector.load %arg8[%c0_13, %c0_14] : memref<1x64xf32, #tpu.memory_space<vmem>>, vector<1x64xf32>
    %16 = vector.broadcast %15 : vector<1x64xf32> to vector<8x64xf32>
    %17 = arith.addf %14, %16 : vector<8x64xf32>
    %c0_15 = arith.constant 0 : index
    %c0_16 = arith.constant 0 : index
    %18 = vector.load %arg2[%c0_15, %c0_16] : memref<8x2xf32, #tpu.memory_space<vmem>>, vector<8x2xf32>
    %c0_17 = arith.constant 0 : index
    %c0_18 = arith.constant 0 : index
    %19 = vector.load %arg7[%c0_17, %c0_18] : memref<2x64xf32, #tpu.memory_space<vmem>>, vector<2x64xf32>
    %20 = vector.extract_strided_slice %18 {offsets = [0, 0], sizes = [8, 1], strides = [1, 1]} : vector<8x2xf32> to vector<8x1xf32>
    %21 = vector.extract_strided_slice %19 {offsets = [0, 0], sizes = [1, 64], strides = [1, 1]} : vector<2x64xf32> to vector<1x64xf32>
    %22 = vector.broadcast %20 : vector<8x1xf32> to vector<8x64xf32>
    %23 = vector.broadcast %21 : vector<1x64xf32> to vector<8x64xf32>
    %24 = arith.mulf %22, %23 : vector<8x64xf32>
    %25 = arith.addf %17, %24 : vector<8x64xf32>
    %26 = vector.extract_strided_slice %18 {offsets = [0, 1], sizes = [8, 1], strides = [1, 1]} : vector<8x2xf32> to vector<8x1xf32>
    %27 = vector.extract_strided_slice %19 {offsets = [1, 0], sizes = [1, 64], strides = [1, 1]} : vector<2x64xf32> to vector<1x64xf32>
    %28 = vector.broadcast %26 : vector<8x1xf32> to vector<8x64xf32>
    %29 = vector.broadcast %27 : vector<1x64xf32> to vector<8x64xf32>
    %30 = arith.mulf %28, %29 : vector<8x64xf32>
    %31 = arith.addf %25, %30 : vector<8x64xf32>
    %cst_19 = arith.constant 0.000000e+00 : f32
    %32 = vector.broadcast %cst_19 : f32 to vector<8x64xf32>
    %33 = arith.cmpf oge, %31, %32 : vector<8x64xf32>
    %cst_20 = arith.constant 0.00999999977 : f32
    %34 = vector.broadcast %cst_20 : f32 to vector<8x64xf32>
    %35 = arith.mulf %34, %31 : vector<8x64xf32>
    %36 = arith.select %33, %31, %35 : vector<8x64xi1>, vector<8x64xf32>
    %c0_21 = arith.constant 0 : index
    %c0_22 = arith.constant 0 : index
    %37 = vector.load %arg9[%c0_21, %c0_22] : memref<64x64xf32, #tpu.memory_space<vmem>>, vector<64x64xf32>
    %cst_23 = arith.constant dense<0.000000e+00> : vector<8x64xf32>
    %38 = tpu.matmul %36, %37, %cst_23 {dimension_numbers = #tpu.dot_dimension_numbers<[1], [0], [0], [1], [0, 0, 1, 1], [], []>} : vector<8x64xf32>, vector<64x64xf32>, vector<8x64xf32> -> vector<8x64xf32>
    %c0_24 = arith.constant 0 : index
    %c0_25 = arith.constant 0 : index
    %39 = vector.load %arg10[%c0_24, %c0_25] : memref<1x64xf32, #tpu.memory_space<vmem>>, vector<1x64xf32>
    %40 = vector.broadcast %39 : vector<1x64xf32> to vector<8x64xf32>
    %41 = arith.addf %38, %40 : vector<8x64xf32>
    %cst_26 = arith.constant 0.000000e+00 : f32
    %42 = vector.broadcast %cst_26 : f32 to vector<8x64xf32>
    %43 = arith.cmpf oge, %41, %42 : vector<8x64xf32>
    %cst_27 = arith.constant 0.00999999977 : f32
    %44 = vector.broadcast %cst_27 : f32 to vector<8x64xf32>
    %45 = arith.mulf %44, %41 : vector<8x64xf32>
    %46 = arith.select %43, %41, %45 : vector<8x64xi1>, vector<8x64xf32>
    %c0_28 = arith.constant 0 : index
    %c0_29 = arith.constant 0 : index
    %47 = vector.load %arg11[%c0_28, %c0_29] : memref<64x128xf32, #tpu.memory_space<vmem>>, vector<64x128xf32>
    %cst_30 = arith.constant dense<0.000000e+00> : vector<8x128xf32>
    %48 = tpu.matmul %46, %47, %cst_30 {dimension_numbers = #tpu.dot_dimension_numbers<[1], [0], [0], [1], [0, 0, 1, 1], [], []>} : vector<8x64xf32>, vector<64x128xf32>, vector<8x128xf32> -> vector<8x128xf32>
    %c0_31 = arith.constant 0 : index
    %c0_32 = arith.constant 0 : index
    %49 = vector.load %arg12[%c0_31, %c0_32] : memref<1x128xf32, #tpu.memory_space<vmem>>, vector<1x128xf32>
    %50 = vector.broadcast %49 : vector<1x128xf32> to vector<8x128xf32>
    %51 = arith.addf %48, %50 : vector<8x128xf32>
    %52 = tpu.iota {dimensions = array<i32: 1>} : vector<8x128xi32>
    %cst_33 = arith.constant 0.000000e+00 : f32
    %53 = vector.broadcast %cst_33 : f32 to vector<8x128xf32>
    %54 = arith.maximumf %51, %53 : vector<8x128xf32>
    %55 = math.absf %51 : vector<8x128xf32>
    %cst_34 = arith.constant 0.000000e+00 : f32
    %56 = vector.broadcast %cst_34 : f32 to vector<8x128xf32>
    %57 = arith.subf %56, %55 : vector<8x128xf32>
    %58 = math.exp %57 : vector<8x128xf32>
    %cst_35 = arith.constant 1.000000e+00 : f32
    %59 = vector.broadcast %cst_35 : f32 to vector<8x128xf32>
    %60 = arith.addf %59, %58 : vector<8x128xf32>
    %61 = math.log %60 : vector<8x128xf32>
    %62 = arith.addf %54, %61 : vector<8x128xf32>
    %c2_i32 = arith.constant 2 : i32
    %63 = vector.broadcast %c2_i32 : i32 to vector<8x128xi32>
    %64 = arith.cmpi eq, %52, %63 : vector<8x128xi32>
    %c5_i32 = arith.constant 5 : i32
    %65 = vector.broadcast %c5_i32 : i32 to vector<8x128xi32>
    %66 = arith.cmpi eq, %52, %65 : vector<8x128xi32>
    %67 = arith.ori %64, %66 : vector<8x128xi1>
    %68 = arith.select %67, %62, %51 : vector<8x128xi1>, vector<8x128xf32>
    %c0_36 = arith.constant 0 : index
    %c0_37 = arith.constant 0 : index
    %69 = vector.load %arg13[%c0_36, %c0_37] : memref<8x128xf32, #tpu.memory_space<vmem>>, vector<8x128xf32>
    tpu.vector_store %arg13[%c0_36, %c0_37], %68 {strides = array<i32>} : memref<8x128xf32, #tpu.memory_space<vmem>>, vector<8x128xf32>,
    return
  }
  func.func @transform_0(%arg0: i32) -> (i32, i32) {
    %c0_i32 = arith.constant 0 : i32
    %c0_i32_0 = arith.constant 0 : i32
    return %arg0, %c0_i32 : i32, i32
  }
  func.func @transform_1(%arg0: i32) -> (i32, i32) {
    %c0_i32 = arith.constant 0 : i32
    %c0_i32_0 = arith.constant 0 : i32
    return %arg0, %c0_i32 : i32, i32
  }
  func.func @transform_2(%arg0: i32) -> (i32, i32) {
    %c0_i32 = arith.constant 0 : i32
    %c0_i32_0 = arith.constant 0 : i32
    %c0_i32_1 = arith.constant 0 : i32
    return %c0_i32, %c0_i32_0 : i32, i32
  }
  func.func @transform_3(%arg0: i32) -> (i32, i32) {
    %c0_i32 = arith.constant 0 : i32
    %c0_i32_0 = arith.constant 0 : i32
    %c0_i32_1 = arith.constant 0 : i32
    return %c0_i32, %c0_i32_0 : i32, i32
  }
  func.func @transform_4(%arg0: i32) -> (i32, i32) {
    %c0_i32 = arith.constant 0 : i32
    %c0_i32_0 = arith.constant 0 : i32
    %c0_i32_1 = arith.constant 0 : i32
    return %c0_i32, %c0_i32_0 : i32, i32
  }
  func.func @transform_5(%arg0: i32) -> (i32, i32) {
    %c0_i32 = arith.constant 0 : i32
    %c0_i32_0 = arith.constant 0 : i32
    %c0_i32_1 = arith.constant 0 : i32
    return %c0_i32, %c0_i32_0 : i32, i32
  }
  func.func @transform_6(%arg0: i32) -> (i32, i32) {
    %c0_i32 = arith.constant 0 : i32
    %c0_i32_0 = arith.constant 0 : i32
    %c0_i32_1 = arith.constant 0 : i32
    return %c0_i32, %c0_i32_0 : i32, i32
  }
  func.func @transform_7(%arg0: i32) -> (i32, i32) {
    %c0_i32 = arith.constant 0 : i32
    %c0_i32_0 = arith.constant 0 : i32
    %c0_i32_1 = arith.constant 0 : i32
    return %c0_i32, %c0_i32_0 : i32, i32
  }
  func.func @transform_8(%arg0: i32) -> (i32, i32) {
    %c0_i32 = arith.constant 0 : i32
    %c0_i32_0 = arith.constant 0 : i32
    %c0_i32_1 = arith.constant 0 : i32
    return %c0_i32, %c0_i32_0 : i32, i32
  }
  func.func @transform_9(%arg0: i32) -> (i32, i32) {
    %c0_i32 = arith.constant 0 : i32
    %c0_i32_0 = arith.constant 0 : i32
    %c0_i32_1 = arith.constant 0 : i32
    return %c0_i32, %c0_i32_0 : i32, i32
  }
  func.func @transform_10(%arg0: i32) -> (i32, i32) {
    %c0_i32 = arith.constant 0 : i32
    %c0_i32_0 = arith.constant 0 : i32
    %c0_i32_1 = arith.constant 0 : i32
    return %c0_i32, %c0_i32_0 : i32, i32
  }
  func.func @transform_11(%arg0: i32) -> (i32, i32) {
    %c0_i32 = arith.constant 0 : i32
    %c0_i32_0 = arith.constant 0 : i32
    %c0_i32_1 = arith.constant 0 : i32
    return %c0_i32, %c0_i32_0 : i32, i32
  }
  func.func @transform_12(%arg0: i32) -> (i32, i32) {
    %c0_i32 = arith.constant 0 : i32
    %c0_i32_0 = arith.constant 0 : i32
    return %arg0, %c0_i32 : i32, i32
  }
}

</mosaic_0001>

<bundles_post_ra>
// kernel: _forward_fn.1
= control target key start
LH: loop header
LB: loop body
LE: loop exit
PB: predicated region body
PF: predicated region fallthrough
CT: control target
= control target key end

     0   :  { %vm117_vm0 = vcmask 293888   ;;  %vm310_vm1 = vcmask 1043456   ;;  %s2530_s3 = inlined_call_operand.vmem [shape: f32[36,48], index: 3, kind: input, shape index: {}]   ;;  %s2531_s0 = inlined_call_operand.vmem [shape: f32[512,36], index: 0, kind: input, shape index: {}]   ;;  %s2532_s2 = inlined_call_operand.vmem [shape: f32[8,512], index: 2, kind: input, shape index: {}]   ;;  %s2533_s4 = inlined_call_operand.vmem [shape: f32[1,48], index: 4, kind: input, shape index: {}]   ;;  %s2534_s5 = inlined_call_operand.vmem [shape: f32[48,64], index: 5, kind: input, shape index: {}]   ;;  %s2535_s1 = inlined_call_operand.vmem [shape: f32[8,2], index: 1, kind: input, shape index: {}]   ;;  %s2536_s8 = inlined_call_operand.vmem [shape: f32[64,64], index: 8, kind: input, shape index: {}]   ;;  %s2537_s6 = inlined_call_operand.vmem [shape: f32[2,64], index: 6, kind: input, shape index: {}]   ;;  %s2538_s7 = inlined_call_operand.vmem [shape: f32[1,64], index: 7, kind: input, shape index: {}]   ;;  %s2539_s10 = inlined_call_operand.vmem [shape: f32[64,128], index: 10, kind: input, shape index: {}]   ;;  %s2540_s9 = inlined_call_operand.vmem [shape: f32[1,64], index: 9, kind: input, shape index: {}]   ;;  %s2541_s11 = inlined_call_operand.vmem [shape: f32[1,128], index: 11, kind: input, shape index: {}]   ;;  %s2542_s12 = inlined_call_operand.vmem [shape: f32[8,128], index: 12, kind: output, shape index: {}]  }
   0x1   :  { %v105_v0 = vld [vmem:[%s2530_s3] sm:$0xff]  ;;  %v106_v1 = vld [vmem:[%s2530_s3 + $0x8] sm:$0xff]  ;;  %v107_v2 = vld [vmem:[%s2530_s3 + $0x10] sm:$0xff] }
   0x2   :  { %v1743_v3 = vpack.c.bf16 %v106_v1, %v105_v0  ;;  %v108_v4 = vld [vmem:[%s2530_s3 + $0x18] sm:$0xff]  ;;  %v41_v5 = vld [vmem:[%s2531_s0] sm:$0xff]  ;;  %v42_v8 = vld [vmem:[%s2531_s0 + $0x8] sm:$0xff] }
   0x3   :  { %v1747_v6 = vpack.c.bf16 %v108_v4, %v107_v2  ;;  %1594 = vmatprep.mubr.msk.f32.mxu0 %vm117_vm0, %v41_v5  ;;  %v109_v7 = vld [vmem:[%s2530_s3 + $0x20] sm:$0xf]  ;;  %v43_v9 = vld [vmem:[%s2531_s0 + $0x10] sm:$0xff]  ;;  %v44_v10 = vld [vmem:[%s2531_s0 + $0x18] sm:$0xff] }
   0x4   :  { %1744 = vmatprep.subr.bf16.mxu0 %v1743_v3  ;;  %v45_v11 = vld [vmem:[%s2531_s0 + $0x20] sm:$0xff]  ;;  %v46_v12 = vld [vmem:[%s2531_s0 + $0x28] sm:$0xff]  ;;  %v47_v13 = vld [vmem:[%s2531_s0 + $0x30] sm:$0xff] }
   0x5   :  { %1746 = vmatpush3.bf16.msra.mxu0 %v1743_v3  ;;  %v48_v14 = vld [vmem:[%s2531_s0 + $0x38] sm:$0xff]  ;;  %v49_v15 = vld [vmem:[%s2531_s0 + $0x40] sm:$0xff]  ;;  %v50_v16 = vld [vmem:[%s2531_s0 + $0x48] sm:$0xff] }
   0x6   :  { %1748 = vmatprep.subr.bf16.mxu0 %v1747_v6  ;;  %v51_v17 = vld [vmem:[%s2531_s0 + $0x50] sm:$0xff]  ;;  %v52_v18 = vld [vmem:[%s2531_s0 + $0x58] sm:$0xff]  ;;  %v53_v19 = vld [vmem:[%s2531_s0 + $0x60] sm:$0xff] }
   0x7   :  { %v54_v20 = vld [vmem:[%s2531_s0 + $0x68] sm:$0xff]  ;;  %v55_v21 = vld [vmem:[%s2531_s0 + $0x70] sm:$0xff]  ;;  %v56_v22 = vld [vmem:[%s2531_s0 + $0x78] sm:$0xff] }
   0x8   :  { %v57_v23 = vld [vmem:[%s2531_s0 + $0x80] sm:$0xff]  ;;  %v58_v24 = vld [vmem:[%s2531_s0 + $0x88] sm:$0xff]  ;;  %v59_v25 = vld [vmem:[%s2531_s0 + $0x90] sm:$0xff] }
   0x9   :  { %1750 = vmatpush3.bf16.msra.mxu0 %v1747_v6  ;;  %v60_v26 = vld [vmem:[%s2531_s0 + $0x98] sm:$0xff]  ;;  %v61_v27 = vld [vmem:[%s2531_s0 + $0xa0] sm:$0xff]  ;;  %v62_v28 = vld [vmem:[%s2531_s0 + $0xa8] sm:$0xff] }
   0xa   :  { %1592 = vmatprep.subr.msk.mxu0 %vm310_vm1, %v109_v7  ;;  %v63_v29 = vld [vmem:[%s2531_s0 + $0xb0] sm:$0xff]  ;;  %v64_v30 = vld [vmem:[%s2531_s0 + $0xb8] sm:$0xff]  ;;  %v65_v31 = vld [vmem:[%s2531_s0 + $0xc0] sm:$0xff] }
   0xb   :  { %v66_v32 = vld [vmem:[%s2531_s0 + $0xc8] sm:$0xff]  ;;  %v67_v33 = vld [vmem:[%s2531_s0 + $0xd0] sm:$0xff]  ;;  %v68_v34 = vld [vmem:[%s2531_s0 + $0xd8] sm:$0xff] }
   0xc   :  { %v69_v35 = vld [vmem:[%s2531_s0 + $0xe0] sm:$0xff]  ;;  %v70_v36 = vld [vmem:[%s2531_s0 + $0xe8] sm:$0xff]  ;;  %v71_v37 = vld [vmem:[%s2531_s0 + $0xf0] sm:$0xff] }
   0xd   :  { %1593 = vmatpush3.msk.msra.mxu0 %vm310_vm1, %v109_v7  ;;  %v72_v38 = vld [vmem:[%s2531_s0 + $0xf8] sm:$0xff]  ;;  %v73_v39 = vld [vmem:[%s2531_s0 + $0x100] sm:$0xff]  ;;  %v74_v40 = vld [vmem:[%s2531_s0 + $0x108] sm:$0xff] }
   0xe   :  { %1595 = vmatmul.mubr.msk.f32.vlgmr.msra.gmra.mrb[0].mxu0 %vm117_vm0, %v42_v8  ;;  %v75_v41 = vld [vmem:[%s2531_s0 + $0x110] sm:$0xff]  ;;  %v76_v42 = vld [vmem:[%s2531_s0 + $0x118] sm:$0xff]  ;;  %v77_v43 = vld [vmem:[%s2531_s0 + $0x120] sm:$0xff] }
   0xf   :  { %1597 = vmatprep.mubr.msk.f32.mxu0 %vm117_vm0, %v43_v9  ;;  %v78_v44 = vld [vmem:[%s2531_s0 + $0x128] sm:$0xff]  ;;  %v79_v45 = vld [vmem:[%s2531_s0 + $0x130] sm:$0xff]  ;;  %v80_v46 = vld [vmem:[%s2531_s0 + $0x138] sm:$0xff] }
  0x10   :  { %v81_v47 = vld [vmem:[%s2531_s0 + $0x140] sm:$0xff]  ;;  %v82_v48 = vld [vmem:[%s2531_s0 + $0x148] sm:$0xff]  ;;  %v83_v49 = vld [vmem:[%s2531_s0 + $0x150] sm:$0xff] }
  0x11   :  { %v84_v50 = vld [vmem:[%s2531_s0 + $0x158] sm:$0xff]  ;;  %v85_v51 = vld [vmem:[%s2531_s0 + $0x160] sm:$0xff]  ;;  %v86_v52 = vld [vmem:[%s2531_s0 + $0x168] sm:$0xff] }
  0x12   :  { %1598 = vmatmul.mubr.msk.f32.gmra.mrb[2].mxu0 %vm117_vm0, %v44_v10  ;;  %v87_v53 = vld [vmem:[%s2531_s0 + $0x170] sm:$0xff]  ;;  %v88_v54 = vld [vmem:[%s2531_s0 + $0x178] sm:$0xff]  ;;  %v89_v55 = vld [vmem:[%s2531_s0 + $0x180] sm:$0xff] }
  0x13   :  { %1600 = vmatprep.mubr.msk.f32.mxu0 %vm117_vm0, %v45_v11  ;;  %v90_v56 = vld [vmem:[%s2531_s0 + $0x188] sm:$0xff]  ;;  %v91_v57 = vld [vmem:[%s2531_s0 + $0x190] sm:$0xff]  ;;  %v92_v58 = vld [vmem:[%s2531_s0 + $0x198] sm:$0xff] }
  0x14   :  { %v93_v59 = vld [vmem:[%s2531_s0 + $0x1a0] sm:$0xff]  ;;  %v94_v60 = vld [vmem:[%s2531_s0 + $0x1a8] sm:$0xff]  ;;  %v95_v61 = vld [vmem:[%s2531_s0 + $0x1b0] sm:$0xff] }
  0x15   :  { %v96_v62 = vld [vmem:[%s2531_s0 + $0x1b8] sm:$0xff]  ;;  %v97_v63 = vld [vmem:[%s2531_s0 + $0x1c0] sm:$0xff]  ;;  %v98_v0 = vld [vmem:[%s2531_s0 + $0x1c8] sm:$0xff] }
  0x16   :  { %1601 = vmatmul.mubr.msk.f32.gmra.mrb[4].mxu0 %vm117_vm0, %v46_v12  ;;  %v99_v1 = vld [vmem:[%s2531_s0 + $0x1d0] sm:$0xff]  ;;  %v100_v2 = vld [vmem:[%s2531_s0 + $0x1d8] sm:$0xff]  ;;  %v101_v3 = vld [vmem:[%s2531_s0 + $0x1e0] sm:$0xff] }
  0x17   :  { %1603 = vmatprep.mubr.msk.f32.mxu0 %vm117_vm0, %v47_v13  ;;  %v102_v4 = vld [vmem:[%s2531_s0 + $0x1e8] sm:$0xff]  ;;  %v103_v5 = vld [vmem:[%s2531_s0 + $0x1f0] sm:$0xff]  ;;  %v104_v6 = vld [vmem:[%s2531_s0 + $0x1f8] sm:$0xff] }
  0x18   :  { %v892_v7 = vld [vmem:[%s2532_s2 + $0x8] sm:$0xff]  ;;  %v2206_v8 = vld [vmem:[%s2533_s4] ss:$0 sm:$0xff] }
  0x19   :  { %959 = vmatprep.mubr.f32.mxu1 %v892_v7 }
  0x1a   :  { %1604 = vmatmul.mubr.msk.f32.gmra.mrb[6].mxu0 %vm117_vm0, %v48_v14 }
  0x1b   :  { %1606 = vmatprep.mubr.msk.f32.mxu0 %vm117_vm0, %v49_v15 }
  0x1e   :  { %1607 = vmatmul.mubr.msk.f32.gmra.mrb[8].mxu0 %vm117_vm0, %v50_v16 }
  0x1f   :  { %1609 = vmatprep.mubr.msk.f32.mxu0 %vm117_vm0, %v51_v17 }
  0x22   :  { %1610 = vmatmul.mubr.msk.f32.gmra.mrb[10].mxu0 %vm117_vm0, %v52_v18 }
  0x23   :  { %1612 = vmatprep.mubr.msk.f32.mxu0 %vm117_vm0, %v53_v19 }
  0x26   :  { %1613 = vmatmul.mubr.msk.f32.gmra.mrb[12].mxu0 %vm117_vm0, %v54_v20 }
  0x27   :  { %1615 = vmatprep.mubr.msk.f32.mxu0 %vm117_vm0, %v55_v21 }
  0x2a   :  { %1616 = vmatmul.mubr.msk.f32.gmra.mrb[14].mxu0 %vm117_vm0, %v56_v22 }
  0x2b   :  { %1618 = vmatprep.mubr.msk.f32.mxu0 %vm117_vm0, %v57_v23 }
  0x2e   :  { %1619 = vmatmul.mubr.msk.f32.gmra.mrb[16].mxu0 %vm117_vm0, %v58_v24 }
  0x2f   :  { %1621 = vmatprep.mubr.msk.f32.mxu0 %vm117_vm0, %v59_v25 }
  0x32   :  { %1622 = vmatmul.mubr.msk.f32.gmra.mrb[18].mxu0 %vm117_vm0, %v60_v26 }
  0x33   :  { %1624 = vmatprep.mubr.msk.f32.mxu0 %vm117_vm0, %v61_v27 }
  0x36   :  { %1625 = vmatmul.mubr.msk.f32.gmra.mrb[20].mxu0 %vm117_vm0, %v62_v28 }
  0x37   :  { %1627 = vmatprep.mubr.msk.f32.mxu0 %vm117_vm0, %v63_v29 }
  0x3a   :  { %1628 = vmatmul.mubr.msk.f32.gmra.mrb[22].mxu0 %vm117_vm0, %v64_v30 }
  0x3b   :  { %1630 = vmatprep.mubr.msk.f32.mxu0 %vm117_vm0, %v65_v31 }
  0x3e   :  { %1631 = vmatmul.mubr.msk.f32.gmra.mrb[24].mxu0 %vm117_vm0, %v66_v32 }
  0x3f   :  { %1633 = vmatprep.mubr.msk.f32.mxu0 %vm117_vm0, %v67_v33 }
  0x42   :  { %1634 = vmatmul.mubr.msk.f32.gmra.mrb[26].mxu0 %vm117_vm0, %v68_v34 }
  0x43   :  { %1636 = vmatprep.mubr.msk.f32.mxu0 %vm117_vm0, %v69_v35 }
  0x46   :  { %1637 = vmatmul.mubr.msk.f32.gmra.mrb[28].mxu0 %vm117_vm0, %v70_v36 }
  0x47   :  { %1639 = vmatprep.mubr.msk.f32.mxu0 %vm117_vm0, %v71_v37 }
  0x4a   :  { %1640 = vmatmul.mubr.msk.f32.gmra.mrb[30].mxu0 %vm117_vm0, %v72_v38 }
  0x4b   :  { %1642 = vmatprep.mubr.msk.f32.mxu0 %vm117_vm0, %v73_v39 }
  0x4e   :  { %1643 = vmatmul.mubr.msk.f32.gmra.mrb[32].mxu0 %vm117_vm0, %v74_v40 }
  0x4f   :  { %1645 = vmatprep.mubr.msk.f32.mxu0 %vm117_vm0, %v75_v41 }
  0x52   :  { %1646 = vmatmul.mubr.msk.f32.gmra.mrb[34].mxu0 %vm117_vm0, %v76_v42 }
  0x53   :  { %1648 = vmatprep.mubr.msk.f32.mxu0 %vm117_vm0, %v77_v43 }
  0x56   :  { %1649 = vmatmul.mubr.msk.f32.gmra.mrb[36].mxu0 %vm117_vm0, %v78_v44 }
  0x57   :  { %1651 = vmatprep.mubr.msk.f32.mxu0 %vm117_vm0, %v79_v45 }
  0x5a   :  { %1652 = vmatmul.mubr.msk.f32.gmra.mrb[38].mxu0 %vm117_vm0, %v80_v46 }
  0x5b   :  { %1654 = vmatprep.mubr.msk.f32.mxu0 %vm117_vm0, %v81_v47 }
  0x5e   :  { %1655 = vmatmul.mubr.msk.f32.gmra.mrb[40].mxu0 %vm117_vm0, %v82_v48 }
  0x5f   :  { %1657 = vmatprep.mubr.msk.f32.mxu0 %vm117_vm0, %v83_v49 }
  0x62   :  { %1658 = vmatmul.mubr.msk.f32.gmra.mrb[42].mxu0 %vm117_vm0, %v84_v50 }
  0x63   :  { %1660 = vmatprep.mubr.msk.f32.mxu0 %vm117_vm0, %v85_v51 }
  0x66   :  { %1661 = vmatmul.mubr.msk.f32.gmra.mrb[44].mxu0 %vm117_vm0, %v86_v52 }
  0x67   :  { %1663 = vmatprep.mubr.msk.f32.mxu0 %vm117_vm0, %v87_v53 }
  0x6a   :  { %1664 = vmatmul.mubr.msk.f32.gmra.mrb[46].mxu0 %vm117_vm0, %v88_v54 }
  0x6b   :  { %1666 = vmatprep.mubr.msk.f32.mxu0 %vm117_vm0, %v89_v55 }
  0x6e   :  { %1667 = vmatmul.mubr.msk.f32.gmra.mrb[48].mxu0 %vm117_vm0, %v90_v56 }
  0x6f   :  { %1669 = vmatprep.mubr.msk.f32.mxu0 %vm117_vm0, %v91_v57 }
  0x72   :  { %1670 = vmatmul.mubr.msk.f32.gmra.mrb[50].mxu0 %vm117_vm0, %v92_v58 }
  0x73   :  { %1672 = vmatprep.mubr.msk.f32.mxu0 %vm117_vm0, %v93_v59 }
  0x76   :  { %1673 = vmatmul.mubr.msk.f32.gmra.mrb[52].mxu0 %vm117_vm0, %v94_v60 }
  0x77   :  { %1675 = vmatprep.mubr.msk.f32.mxu0 %vm117_vm0, %v95_v61 }
  0x7a   :  { %1676 = vmatmul.mubr.msk.f32.gmra.mrb[54].mxu0 %vm117_vm0, %v96_v62 }
  0x7b   :  { %1678 = vmatprep.mubr.msk.f32.mxu0 %vm117_vm0, %v97_v63 }
  0x7e   :  { %1679 = vmatmul.mubr.msk.f32.gmra.mrb[56].mxu0 %vm117_vm0, %v98_v0 }
  0x7f   :  { %1681 = vmatprep.mubr.msk.f32.mxu0 %vm117_vm0, %v99_v1 }
  0x82   :  { %1682 = vmatmul.mubr.msk.f32.gmra.mrb[58].mxu0 %vm117_vm0, %v100_v2 }
  0x83   :  { %1684 = vmatprep.mubr.msk.f32.mxu0 %vm117_vm0, %v101_v3 }
  0x86   :  { %1685 = vmatmul.mubr.msk.f32.gmra.mrb[60].mxu0 %vm117_vm0, %v102_v4 }
  0x87   :  { %1687 = vmatprep.mubr.msk.f32.mxu0 %vm117_vm0, %v103_v5 }
  0x8a   :  { %1688 = vmatmul.mubr.msk.f32.gmra.mrb[62].mxu0 %vm117_vm0, %v104_v6 }
  0xe1   :  { %v1596_v9 = vpop.f32.mrb[0].mxu0 }
  0xe2   :  { %v386_v10 = vadd.f32 %v1596_v9, %v2206_v8  ;;  %v380_v11 = vpop.f32.mrb[1].mxu0 }
  0xe3   :  { %v381_v12 = vadd.f32 %v2206_v8, %v380_v11 }
  0xe4   :  { %v764_v13 = vmul.f32 0.01, %v386_v10  ;;  %vm700_vm2 = vcmp.ge.f32.partialorder %v386_v10, 0.0 }
  0xe5   :  { %v763_v14 = vmul.f32 0.01, %v381_v12  ;;  %v1599_v15 = vpop.f32.mrb[2].mxu0  ;;  %vm699_vm3 = vcmp.ge.f32.partialorder %v381_v12, 0.0 }
  0xe6   :  { %v396_v16 = vadd.f32 %v1599_v15, %v2206_v8  ;;  %v390_v17 = vpop.f32.mrb[3].mxu0  ;;  %v2211_v18 = vsel %vm700_vm2, %v386_v10, %v764_v13 }
  0xe7   :  { %v391_v19 = vadd.f32 %v2206_v8, %v390_v17  ;;  %v2214_v20 = vsel %vm699_vm3, %v381_v12, %v763_v14 }
  0xe8   :  { %vm702_vm4 = vcmp.ge.f32.partialorder %v396_v16, 0.0  ;;  %v766_v21 = vmul.f32 0.01, %v396_v16  ;;  %v1753_v22 = vpack.c.bf16 %v2211_v18, %v2214_v20 }
  0xe9   :  { %vm701_vm5 = vcmp.ge.f32.partialorder %v391_v19, 0.0  ;;  %v765_v23 = vmul.f32 0.01, %v391_v19  ;;  %v1602_v24 = vpop.f32.mrb[4].mxu0 }
  0xea   :  { %v406_v25 = vadd.f32 %v1602_v24, %v2206_v8  ;;  %v400_v26 = vpop.f32.mrb[5].mxu0  ;;  %v2219_v27 = vsel %vm702_vm4, %v396_v16, %v766_v21 }
  0xeb   :  { %v401_v28 = vadd.f32 %v2206_v8, %v400_v26  ;;  %v2222_v29 = vsel %vm701_vm5, %v391_v19, %v765_v23 }
  0xec   :  { %vm704_vm6 = vcmp.ge.f32.partialorder %v406_v25, 0.0  ;;  %v768_v30 = vmul.f32 0.01, %v406_v25  ;;  %v1757_v31 = vpack.c.bf16 %v2219_v27, %v2222_v29 }
  0xed   :  { %vm703_vm7 = vcmp.ge.f32.partialorder %v401_v28, 0.0  ;;  %v767_v32 = vmul.f32 0.01, %v401_v28  ;;  %v1605_v33 = vpop.f32.mrb[6].mxu0 }
  0xee   :  { %v416_v34 = vadd.f32 %v1605_v33, %v2206_v8  ;;  %v410_v35 = vpop.f32.mrb[7].mxu0  ;;  %v2227_v36 = vsel %vm704_vm6, %v406_v25, %v768_v30 }
  0xef   :  { %v411_v37 = vadd.f32 %v2206_v8, %v410_v35  ;;  %v2230_v38 = vsel %vm703_vm7, %v401_v28, %v767_v32 }
  0xf0   :  { %vm706_vm8 = vcmp.ge.f32.partialorder %v416_v34, 0.0  ;;  %v770_v39 = vmul.f32 0.01, %v416_v34  ;;  %v1761_v40 = vpack.c.bf16 %v2227_v36, %v2230_v38 }
  0xf1   :  { %vm705_vm9 = vcmp.ge.f32.partialorder %v411_v37, 0.0  ;;  %v769_v41 = vmul.f32 0.01, %v411_v37  ;;  %v1608_v42 = vpop.f32.mrb[8].mxu0 }
  0xf2   :  { %v426_v43 = vadd.f32 %v1608_v42, %v2206_v8  ;;  %v420_v44 = vpop.f32.mrb[9].mxu0  ;;  %v2235_v45 = vsel %vm706_vm8, %v416_v34, %v770_v39 }
  0xf3   :  { %v421_v46 = vadd.f32 %v2206_v8, %v420_v44  ;;  %v2238_v47 = vsel %vm705_vm9, %v411_v37, %v769_v41 }
  0xf4   :  { %vm708_vm10 = vcmp.ge.f32.partialorder %v426_v43, 0.0  ;;  %v772_v48 = vmul.f32 0.01, %v426_v43  ;;  %v1765_v49 = vpack.c.bf16 %v2235_v45, %v2238_v47 }
  0xf5   :  { %vm707_vm11 = vcmp.ge.f32.partialorder %v421_v46, 0.0  ;;  %v771_v50 = vmul.f32 0.01, %v421_v46  ;;  %v1611_v51 = vpop.f32.mrb[10].mxu0 }
  0xf6   :  { %v436_v52 = vadd.f32 %v1611_v51, %v2206_v8  ;;  %v430_v53 = vpop.f32.mrb[11].mxu0  ;;  %v2243_v54 = vsel %vm708_vm10, %v426_v43, %v772_v48 }
  0xf7   :  { %v431_v55 = vadd.f32 %v2206_v8, %v430_v53  ;;  %v2246_v56 = vsel %vm707_vm11, %v421_v46, %v771_v50 }
  0xf8   :  { %vm710_vm12 = vcmp.ge.f32.partialorder %v436_v52, 0.0  ;;  %v774_v57 = vmul.f32 0.01, %v436_v52  ;;  %v1769_v58 = vpack.c.bf16 %v2243_v54, %v2246_v56 }
  0xf9   :  { %vm709_vm13 = vcmp.ge.f32.partialorder %v431_v55, 0.0  ;;  %v773_v59 = vmul.f32 0.01, %v431_v55  ;;  %v1614_v60 = vpop.f32.mrb[12].mxu0 }
  0xfa   :  { %v446_v61 = vadd.f32 %v1614_v60, %v2206_v8  ;;  %v440_v62 = vpop.f32.mrb[13].mxu0  ;;  %v2251_v63 = vsel %vm710_vm12, %v436_v52, %v774_v57 }
  0xfb   :  { %v441_v0 = vadd.f32 %v2206_v8, %v440_v62  ;;  %v2254_v1 = vsel %vm709_vm13, %v431_v55, %v773_v59 }
  0xfc   :  { %vm712_vm14 = vcmp.ge.f32.partialorder %v446_v61, 0.0  ;;  %v776_v2 = vmul.f32 0.01, %v446_v61  ;;  %v1773_v3 = vpack.c.bf16 %v2251_v63, %v2254_v1 }
  0xfd   :  { %vm711_vm15 = vcmp.ge.f32.partialorder %v441_v0, 0.0  ;;  %v775_v4 = vmul.f32 0.01, %v441_v0  ;;  %v1617_v5 = vpop.f32.mrb[14].mxu0 }
  0xfe   :  { %v456_v6 = vadd.f32 %v1617_v5, %v2206_v8  ;;  %v450_v7 = vpop.f32.mrb[15].mxu0  ;;  %v2259_v9 = vsel %vm712_vm14, %v446_v61, %v776_v2 }
  0xff   :  { %v451_v10 = vadd.f32 %v2206_v8, %v450_v7  ;;  %v2262_v11 = vsel %vm711_vm15, %v441_v0, %v775_v4 }
 0x100   :  { %vm714_vm0 = vcmp.ge.f32.partialorder %v456_v6, 0.0  ;;  %v778_v12 = vmul.f32 0.01, %v456_v6  ;;  %v1777_v13 = vpack.c.bf16 %v2259_v9, %v2262_v11  ;;  %v891_v9 = vld [vmem:[%s2532_s2] sm:$0xff] }
 0x101   :  { %vm713_vm1 = vcmp.ge.f32.partialorder %v451_v10, 0.0  ;;  %v777_v14 = vmul.f32 0.01, %v451_v10  ;;  %v1620_v15 = vpop.f32.mrb[16].mxu0 }
 0x102   :  { %v466_v16 = vadd.f32 %v1620_v15, %v2206_v8  ;;  %v460_v17 = vpop.f32.mrb[17].mxu0  ;;  %v2267_v19 = vsel %vm714_vm0, %v456_v6, %v778_v12 }
 0x103   :  { %v461_v21 = vadd.f32 %v2206_v8, %v460_v17  ;;  %v2270_v23 = vsel %vm713_vm1, %v451_v10, %v777_v14 }
 0x104   :  { %v780_v24 = vmul.f32 0.01, %v466_v16  ;;  %vm716_vm2 = vcmp.ge.f32.partialorder %v466_v16, 0.0  ;;  %v1781_v25 = vpack.c.bf16 %v2267_v19, %v2270_v23 }
 0x105   :  { %v779_v26 = vmul.f32 0.01, %v461_v21  ;;  %v1623_v28 = vpop.f32.mrb[18].mxu0  ;;  %vm715_vm3 = vcmp.ge.f32.partialorder %v461_v21, 0.0 }
 0x106   :  { %v476_v30 = vadd.f32 %v1623_v28, %v2206_v8  ;;  %v470_v32 = vpop.f32.mrb[19].mxu0  ;;  %v844_v33 = vsel %vm716_vm2, %v466_v16, %v780_v24 }
 0x107   :  { %v471_v34 = vadd.f32 %v2206_v8, %v470_v32  ;;  %v843_v35 = vsel %vm715_vm3, %v461_v21, %v779_v26 }
 0x108   :  { %vm718_vm4 = vcmp.ge.f32.partialorder %v476_v30, 0.0  ;;  %v782_v37 = vmul.f32 0.01, %v476_v30  ;;  %v1751_v39 = vpack.c.bf16 %v844_v33, %v843_v35 }
 0x109   :  { %vm717_vm5 = vcmp.ge.f32.partialorder %v471_v34, 0.0  ;;  %v781_v41 = vmul.f32 0.01, %v471_v34  ;;  %v1626_v42 = vpop.f32.mrb[20].mxu0 }
 0x10a   :  { %v486_v43 = vadd.f32 %v1626_v42, %v2206_v8  ;;  %v480_v44 = vpop.f32.mrb[21].mxu0  ;;  %1752 = vmatprep.subr.bf16.mxu1 %v1751_v39  ;;  %v846_v46 = vsel %vm718_vm4, %v476_v30, %v782_v37 }
 0x10b   :  { %v481_v48 = vadd.f32 %v2206_v8, %v480_v44  ;;  %1754 = vmatpush3.bf16.msra.mxu1 %v1753_v22  ;;  %v845_v50 = vsel %vm717_vm5, %v471_v34, %v781_v41 }
 0x10c   :  { %vm720_vm6 = vcmp.ge.f32.partialorder %v486_v43, 0.0  ;;  %v784_v51 = vmul.f32 0.01, %v486_v43  ;;  %v1755_v52 = vpack.c.bf16 %v846_v46, %v845_v50 }
 0x10d   :  { %vm719_vm7 = vcmp.ge.f32.partialorder %v481_v48, 0.0  ;;  %v783_v53 = vmul.f32 0.01, %v481_v48  ;;  %v1629_v55 = vpop.f32.mrb[22].mxu0 }
 0x10e   :  { %v496_v57 = vadd.f32 %v1629_v55, %v2206_v8  ;;  %v490_v59 = vpop.f32.mrb[23].mxu0  ;;  %1756 = vmatprep.subr.bf16.mxu1 %v1755_v52  ;;  %v848_v60 = vsel %vm720_vm6, %v486_v43, %v784_v51 }
 0x10f   :  { %v491_v61 = vadd.f32 %v2206_v8, %v490_v59  ;;  %1758 = vmatpush3.bf16.msra.mxu1 %v1757_v31  ;;  %v847_v18 = vsel %vm719_vm7, %v481_v48, %v783_v53 }
 0x110   :  { %vm722_vm8 = vcmp.ge.f32.partialorder %v496_v57, 0.0  ;;  %v786_v20 = vmul.f32 0.01, %v496_v57  ;;  %v1759_v22 = vpack.c.bf16 %v848_v60, %v847_v18  ;;  %v894_v60 = vld [vmem:[%s2532_s2 + $0x18] sm:$0xff] }
 0x111   :  { %vm721_vm9 = vcmp.ge.f32.partialorder %v491_v61, 0.0  ;;  %v785_v62 = vmul.f32 0.01, %v491_v61  ;;  %v1632_v0 = vpop.f32.mrb[24].mxu0 }
 0x112   :  { %v506_v2 = vadd.f32 %v1632_v0, %v2206_v8  ;;  %v500_v4 = vpop.f32.mrb[25].mxu0  ;;  %1760 = vmatprep.subr.bf16.mxu1 %v1759_v22  ;;  %v850_v5 = vsel %vm722_vm8, %v496_v57, %v786_v20 }
 0x113   :  { %v501_v6 = vadd.f32 %v2206_v8, %v500_v4  ;;  %1762 = vmatpush3.bf16.msra.mxu1 %v1761_v40  ;;  %v849_v27 = vsel %vm721_vm9, %v491_v61, %v785_v62 }
 0x114   :  { %vm724_vm10 = vcmp.ge.f32.partialorder %v506_v2, 0.0  ;;  %v788_v29 = vmul.f32 0.01, %v506_v2  ;;  %v1763_v31 = vpack.c.bf16 %v850_v5, %v849_v27 }
 0x115   :  { %vm723_vm11 = vcmp.ge.f32.partialorder %v501_v6, 0.0  ;;  %v787_v7 = vmul.f32 0.01, %v501_v6  ;;  %v1635_v10 = vpop.f32.mrb[26].mxu0 }
 0x116   :  { %v516_v12 = vadd.f32 %v1635_v10, %v2206_v8  ;;  %v510_v14 = vpop.f32.mrb[27].mxu0  ;;  %1764 = vmatprep.subr.bf16.mxu1 %v1763_v31  ;;  %v852_v15 = vsel %vm724_vm10, %v506_v2, %v788_v29 }
 0x117   :  { %v511_v16 = vadd.f32 %v2206_v8, %v510_v14  ;;  %1766 = vmatpush3.bf16.msra.mxu1 %v1765_v49  ;;  %v851_v36 = vsel %vm723_vm11, %v501_v6, %v787_v7 }
 0x118   :  { %vm726_vm12 = vcmp.ge.f32.partialorder %v516_v12, 0.0  ;;  %v790_v38 = vmul.f32 0.01, %v516_v12  ;;  %v1767_v40 = vpack.c.bf16 %v852_v15, %v851_v36 }
 0x119   :  { %vm725_vm13 = vcmp.ge.f32.partialorder %v511_v16, 0.0  ;;  %v789_v17 = vmul.f32 0.01, %v511_v16  ;;  %v1638_v21 = vpop.f32.mrb[28].mxu0 }
 0x11a   :  { %v526_v24 = vadd.f32 %v1638_v21, %v2206_v8  ;;  %v520_v26 = vpop.f32.mrb[29].mxu0  ;;  %1768 = vmatprep.subr.bf16.mxu1 %v1767_v40  ;;  %v854_v28 = vsel %vm726_vm12, %v516_v12, %v790_v38 }
 0x11b   :  { %v521_v30 = vadd.f32 %v2206_v8, %v520_v26  ;;  %1770 = vmatpush3.bf16.msra.mxu1 %v1769_v58  ;;  %v853_v45 = vsel %vm725_vm13, %v511_v16, %v789_v17 }
 0x11c   :  { %vm728_vm14 = vcmp.ge.f32.partialorder %v526_v24, 0.0  ;;  %v792_v47 = vmul.f32 0.01, %v526_v24  ;;  %v1771_v49 = vpack.c.bf16 %v854_v28, %v853_v45 }
 0x11d   :  { %vm727_vm15 = vcmp.ge.f32.partialorder %v521_v30, 0.0  ;;  %v791_v32 = vmul.f32 0.01, %v521_v30  ;;  %v1641_v33 = vpop.f32.mrb[30].mxu0 }
 0x11e   :  { %v536_v34 = vadd.f32 %v1641_v33, %v2206_v8  ;;  %v530_v35 = vpop.f32.mrb[31].mxu0  ;;  %1772 = vmatprep.subr.bf16.mxu1 %v1771_v49  ;;  %v856_v37 = vsel %vm728_vm14, %v526_v24, %v792_v47 }
 0x11f   :  { %v531_v39 = vadd.f32 %v2206_v8, %v530_v35  ;;  %1774 = vmatpush3.bf16.msra.mxu1 %v1773_v3  ;;  %v855_v54 = vsel %vm727_vm15, %v521_v30, %v791_v32 }
 0x120   :  { %vm730_vm0 = vcmp.ge.f32.partialorder %v536_v34, 0.0  ;;  %v794_v56 = vmul.f32 0.01, %v536_v34  ;;  %v1775_v58 = vpack.c.bf16 %v856_v37, %v855_v54 }
 0x121   :  { %vm729_vm1 = vcmp.ge.f32.partialorder %v531_v39, 0.0  ;;  %v793_v41 = vmul.f32 0.01, %v531_v39  ;;  %v1644_v42 = vpop.f32.mrb[32].mxu0 }
 0x122   :  { %v546_v43 = vadd.f32 %v1644_v42, %v2206_v8  ;;  %v540_v44 = vpop.f32.mrb[33].mxu0  ;;  %1776 = vmatprep.subr.bf16.mxu1 %v1775_v58  ;;  %v858_v46 = vsel %vm730_vm0, %v536_v34, %v794_v56 }
 0x123   :  { %v541_v48 = vadd.f32 %v2206_v8, %v540_v44  ;;  %1778 = vmatpush3.bf16.msra.mxu1 %v1777_v13  ;;  %v857_v63 = vsel %vm729_vm1, %v531_v39, %v793_v41 }
 0x124   :  { %vm732_vm2 = vcmp.ge.f32.partialorder %v546_v43, 0.0  ;;  %v796_v1 = vmul.f32 0.01, %v546_v43  ;;  %v1779_v3 = vpack.c.bf16 %v858_v46, %v857_v63 }
 0x125   :  { %vm731_vm3 = vcmp.ge.f32.partialorder %v541_v48, 0.0  ;;  %v795_v50 = vmul.f32 0.01, %v541_v48  ;;  %v1647_v51 = vpop.f32.mrb[34].mxu0 }
 0x126   :  { %v2311_v52 = vsel %vm732_vm2, %v546_v43, %v796_v1  ;;  %v556_v53 = vadd.f32 %v1647_v51, %v2206_v8  ;;  %v550_v55 = vpop.f32.mrb[35].mxu0  ;;  %1780 = vmatprep.subr.bf16.mxu1 %v1779_v3 }
 0x127   :  { %v2314_v57 = vsel %vm731_vm3, %v541_v48, %v795_v50  ;;  %v551_v59 = vadd.f32 %v2206_v8, %v550_v55  ;;  %1782 = vmatpush3.bf16.msra.mxu1 %v1781_v25 }
 0x128   :  { %v1785_v11 = vpack.c.bf16 %v2311_v52, %v2314_v57  ;;  %vm734_vm4 = vcmp.ge.f32.partialorder %v556_v53, 0.0  ;;  %v798_v13 = vmul.f32 0.01, %v556_v53 }
 0x129   :  { %vm733_vm5 = vcmp.ge.f32.partialorder %v551_v59, 0.0  ;;  %v797_v61 = vmul.f32 0.01, %v551_v59  ;;  %v1650_v18 = vpop.f32.mrb[36].mxu0 }
 0x12a   :  { %v2328_v20 = vsel %vm734_vm4, %v556_v53, %v798_v13  ;;  %v566_v19 = vadd.f32 %v1650_v18, %v2206_v8  ;;  %v560_v23 = vpop.f32.mrb[37].mxu0  ;;  %960 = vmatmul.mubr.f32.vlgmr.msra.gmra.mrb[0].mxu1 %v891_v9 }
 0x12b   :  { %v2331_v25 = vsel %vm733_vm5, %v551_v59, %v797_v61  ;;  %v561_v22 = vadd.f32 %v2206_v8, %v560_v23  ;;  %1029 = vmatprep.mubr.f32.mxu1 %v894_v60 }
 0x12c   :  { %v1789_v62 = vpack.c.bf16 %v2328_v20, %v2331_v25  ;;  %vm736_vm6 = vcmp.ge.f32.partialorder %v566_v19, 0.0  ;;  %v800_v0 = vmul.f32 0.01, %v566_v19 }
 0x12d   :  { %vm735_vm7 = vcmp.ge.f32.partialorder %v561_v22, 0.0  ;;  %v799_v2 = vmul.f32 0.01, %v561_v22  ;;  %v1653_v4 = vpop.f32.mrb[38].mxu0 }
 0x12e   :  { %v2336_v5 = vsel %vm736_vm6, %v566_v19, %v800_v0  ;;  %v576_v6 = vadd.f32 %v1653_v4, %v2206_v8  ;;  %v570_v27 = vpop.f32.mrb[39].mxu0 }
 0x12f   :  { %v2339_v29 = vsel %vm735_vm7, %v561_v22, %v799_v2  ;;  %v571_v31 = vadd.f32 %v2206_v8, %v570_v27 }
 0x130   :  { %v1793_v7 = vpack.c.bf16 %v2336_v5, %v2339_v29  ;;  %vm738_vm8 = vcmp.ge.f32.partialorder %v576_v6, 0.0  ;;  %v802_v10 = vmul.f32 0.01, %v576_v6 }
 0x131   :  { %vm737_vm9 = vcmp.ge.f32.partialorder %v571_v31, 0.0  ;;  %v801_v12 = vmul.f32 0.01, %v571_v31  ;;  %v1656_v14 = vpop.f32.mrb[40].mxu0 }
 0x132   :  { %v2344_v15 = vsel %vm738_vm8, %v576_v6, %v802_v10  ;;  %v586_v16 = vadd.f32 %v1656_v14, %v2206_v8  ;;  %v580_v36 = vpop.f32.mrb[41].mxu0 }
 0x133   :  { %v2347_v38 = vsel %vm737_vm9, %v571_v31, %v801_v12  ;;  %v581_v40 = vadd.f32 %v2206_v8, %v580_v36 }
 0x134   :  { %v1797_v17 = vpack.c.bf16 %v2344_v15, %v2347_v38  ;;  %vm740_vm10 = vcmp.ge.f32.partialorder %v586_v16, 0.0  ;;  %v804_v21 = vmul.f32 0.01, %v586_v16 }
 0x135   :  { %vm739_vm11 = vcmp.ge.f32.partialorder %v581_v40, 0.0  ;;  %v803_v24 = vmul.f32 0.01, %v581_v40  ;;  %v1659_v26 = vpop.f32.mrb[42].mxu0 }
 0x136   :  { %v2352_v28 = vsel %vm740_vm10, %v586_v16, %v804_v21  ;;  %v596_v30 = vadd.f32 %v1659_v26, %v2206_v8  ;;  %v590_v45 = vpop.f32.mrb[43].mxu0 }
 0x137   :  { %v2355_v47 = vsel %vm739_vm11, %v581_v40, %v803_v24  ;;  %v591_v49 = vadd.f32 %v2206_v8, %v590_v45 }
 0x138   :  { %v1801_v32 = vpack.c.bf16 %v2352_v28, %v2355_v47  ;;  %vm742_vm12 = vcmp.ge.f32.partialorder %v596_v30, 0.0  ;;  %v806_v33 = vmul.f32 0.01, %v596_v30 }
 0x139   :  { %vm741_vm13 = vcmp.ge.f32.partialorder %v591_v49, 0.0  ;;  %v805_v34 = vmul.f32 0.01, %v591_v49  ;;  %v1662_v35 = vpop.f32.mrb[44].mxu0 }
 0x13a   :  { %v2360_v37 = vsel %vm742_vm12, %v596_v30, %v806_v33  ;;  %v606_v39 = vadd.f32 %v1662_v35, %v2206_v8  ;;  %v600_v54 = vpop.f32.mrb[45].mxu0 }
 0x13b   :  { %v2363_v56 = vsel %vm741_vm13, %v591_v49, %v805_v34  ;;  %v601_v58 = vadd.f32 %v2206_v8, %v600_v54 }
 0x13c   :  { %v1805_v41 = vpack.c.bf16 %v2360_v37, %v2363_v56  ;;  %vm744_vm14 = vcmp.ge.f32.partialorder %v606_v39, 0.0  ;;  %v808_v42 = vmul.f32 0.01, %v606_v39  ;;  %v1859_v37 = vmov 0.0|0.0   ;;  %v1035_v56 = vld [vmem:[%s2534_s5] sm:$0xff] }
 0x13d   :  { %vm743_vm15 = vcmp.ge.f32.partialorder %v601_v58, 0.0  ;;  %v807_v43 = vmul.f32 0.01, %v601_v58  ;;  %v1665_v44 = vpop.f32.mrb[46].mxu0 }
 0x13e   :  { %v2368_v46 = vsel %vm744_vm14, %v606_v39, %v808_v42  ;;  %v616_v48 = vadd.f32 %v1665_v44, %v2206_v8  ;;  %v610_v63 = vpop.f32.mrb[47].mxu0 }
 0x13f   :  { %v2371_v1 = vsel %vm743_vm15, %v601_v58, %v807_v43  ;;  %v611_v3 = vadd.f32 %v2206_v8, %v610_v63 }
 0x140   :  { %v1809_v50 = vpack.c.bf16 %v2368_v46, %v2371_v1  ;;  %vm746_vm0 = vcmp.ge.f32.partialorder %v616_v48, 0.0  ;;  %v810_v51 = vmul.f32 0.01, %v616_v48  ;;  %v1037_v46 = vld [vmem:[%s2534_s5 + $0x10] sm:$0xff] }
 0x141   :  { %vm745_vm1 = vcmp.ge.f32.partialorder %v611_v3, 0.0  ;;  %v809_v53 = vmul.f32 0.01, %v611_v3  ;;  %v1668_v55 = vpop.f32.mrb[48].mxu0 }
 0x142   :  { %v2376_v59 = vsel %vm746_vm0, %v616_v48, %v810_v51  ;;  %v626_v9 = vadd.f32 %v1668_v55, %v2206_v8  ;;  %v620_v13 = vpop.f32.mrb[49].mxu0 }
 0x143   :  { %v2379_v60 = vsel %vm745_vm1, %v611_v3, %v809_v53  ;;  %v621_v61 = vadd.f32 %v2206_v8, %v620_v13 }
 0x144   :  { %v1813_v18 = vpack.c.bf16 %v2376_v59, %v2379_v60  ;;  %vm748_vm2 = vcmp.ge.f32.partialorder %v626_v9, 0.0  ;;  %v812_v19 = vmul.f32 0.01, %v626_v9  ;;  %v1039_v60 = vld [vmem:[%s2534_s5 + $0x20] sm:$0xff] }
 0x145   :  { %vm747_vm3 = vcmp.ge.f32.partialorder %v621_v61, 0.0  ;;  %v811_v23 = vmul.f32 0.01, %v621_v61  ;;  %v1671_v22 = vpop.f32.mrb[50].mxu0 }
 0x146   :  { %v636_v0 = vadd.f32 %v1671_v22, %v2206_v8  ;;  %v630_v2 = vpop.f32.mrb[51].mxu0  ;;  %v876_v4 = vsel %vm748_vm2, %v626_v9, %v812_v19  ;;  %vm1860_vm2 = vmmov 0  }
 0x147   :  { %v631_v6 = vadd.f32 %v2206_v8, %v630_v2  ;;  %v875_v27 = vsel %vm747_vm3, %v621_v61, %v811_v23  ;;  %vm1048_vm3 = vcmask 392192  }
 0x148   :  { %vm750_vm4 = vcmp.ge.f32.partialorder %v636_v0, 0.0  ;;  %v814_v31 = vmul.f32 0.01, %v636_v0  ;;  %v1783_v10 = vpack.c.bf16 %v876_v4, %v875_v27 }
 0x149   :  { %vm749_vm5 = vcmp.ge.f32.partialorder %v631_v6, 0.0  ;;  %v813_v12 = vmul.f32 0.01, %v631_v6  ;;  %v1674_v14 = vpop.f32.mrb[52].mxu0 }
 0x14a   :  { %v646_v16 = vadd.f32 %v1674_v14, %v2206_v8  ;;  %v640_v36 = vpop.f32.mrb[53].mxu0  ;;  %1784 = vmatprep.subr.bf16.mxu1 %v1783_v10  ;;  %v878_v40 = vsel %vm750_vm4, %v636_v0, %v814_v31 }
 0x14b   :  { %v641_v21 = vadd.f32 %v2206_v8, %v640_v36  ;;  %1786 = vmatpush3.bf16.msra.mxu1 %v1785_v11  ;;  %v877_v24 = vsel %vm749_vm5, %v631_v6, %v813_v12  ;;  %vm1163_vm5 = vcmask 523264  }
 0x14c   :  { %vm752_vm6 = vcmp.ge.f32.partialorder %v646_v16, 0.0  ;;  %v816_v26 = vmul.f32 0.01, %v646_v16  ;;  %v1787_v30 = vpack.c.bf16 %v878_v40, %v877_v24  ;;  %v1862_v24 = vmov 0  }
 0x14d   :  { %vm751_vm7 = vcmp.ge.f32.partialorder %v641_v21, 0.0  ;;  %v815_v45 = vmul.f32 0.01, %v641_v21  ;;  %v1677_v49 = vpop.f32.mrb[54].mxu0  ;;  %1853 = vset.pattern.permute.xlu0 %v1862_v24 }
 0x14e   :  { %v656_v33 = vadd.f32 %v1677_v49, %v2206_v8  ;;  %v650_v34 = vpop.f32.mrb[55].mxu0  ;;  %1788 = vmatprep.subr.bf16.mxu1 %v1787_v30  ;;  %v880_v35 = vsel %vm752_vm6, %v646_v16, %v816_v26  ;;  %v1122_v26 = vld [vmem:[%s2535_s1] sm:$0xff]  ;;  %v1863_v30 = vmov 1  }
 0x14f   :  { %v651_v39 = vadd.f32 %v2206_v8, %v650_v34  ;;  %1790 = vmatpush3.bf16.msra.mxu1 %v1789_v62  ;;  %v879_v52 = vsel %vm751_vm7, %v641_v21, %v815_v45  ;;  %v1861_v21 = vmov 0.0   ;;  %1126 = vperm.xlu0 %1853, %v1122_v26  }
 0x150   :  { %vm754_vm8 = vcmp.ge.f32.partialorder %v656_v33, 0.0  ;;  %v818_v57 = vmul.f32 0.01, %v656_v33  ;;  %v1791_v11 = vpack.c.bf16 %v880_v35, %v879_v52  ;;  %v1148_v35 = vld [vmem:[%s2536_s8] sm:$0xff] }
 0x151   :  { %vm753_vm9 = vcmp.ge.f32.partialorder %v651_v39, 0.0  ;;  %v817_v54 = vmul.f32 0.01, %v651_v39  ;;  %v1680_v58 = vpop.f32.mrb[56].mxu0 }
 0x152   :  { %v666_v42 = vadd.f32 %v1680_v58, %v2206_v8  ;;  %v660_v43 = vpop.f32.mrb[57].mxu0  ;;  %1792 = vmatprep.subr.bf16.mxu1 %v1791_v11  ;;  %v882_v44 = vsel %vm754_vm8, %v656_v33, %v818_v57  ;;  %v1150_v58 = vld [vmem:[%s2536_s8 + $0x10] sm:$0xff] }
 0x153   :  { %v661_v48 = vadd.f32 %v2206_v8, %v660_v43  ;;  %1794 = vmatpush3.bf16.msra.mxu1 %v1793_v7  ;;  %v881_v20 = vsel %vm753_vm9, %v651_v39, %v817_v54  ;;  %1854 = vset.pattern.permute.xlu0 %v1863_v30  ;;  %v1149_v39 = vld [vmem:[%s2536_s8 + $0x8] sm:$0xff] }
 0x154   :  { %vm756_vm10 = vcmp.ge.f32.partialorder %v666_v42, 0.0  ;;  %v820_v25 = vmul.f32 0.01, %v666_v42  ;;  %v1795_v62 = vpack.c.bf16 %v882_v44, %v881_v20  ;;  %1136 = vperm.xlu0 %1854, %v1122_v26   ;;  %v1825_v11 = vpack.c.bf16 %v1149_v39, %v1148_v35  ;;  %v1152_v44 = vld [vmem:[%s2536_s8 + $0x20] sm:$0xff] }
 0x155   :  { %vm755_vm11 = vcmp.ge.f32.partialorder %v661_v48, 0.0  ;;  %v819_v63 = vmul.f32 0.01, %v661_v48  ;;  %v1683_v3 = vpop.f32.mrb[58].mxu0 }
 0x156   :  { %v676_v51 = vadd.f32 %v1683_v3, %v2206_v8  ;;  %v670_v53 = vpop.f32.mrb[59].mxu0  ;;  %1796 = vmatprep.subr.bf16.mxu1 %v1795_v62  ;;  %v884_v55 = vsel %vm756_vm10, %v666_v42, %v820_v25  ;;  %v1151_v42 = vld [vmem:[%s2536_s8 + $0x18] sm:$0xff]  ;;  %v1154_v25 = vld [vmem:[%s2536_s8 + $0x30] sm:$0xff]  ;;  %v1129_v3 = vlaneseq }
 0x157   :  { %v671_v9 = vadd.f32 %v2206_v8, %v670_v53  ;;  %1798 = vmatpush3.bf16.msra.mxu1 %v1797_v17  ;;  %v883_v5 = vsel %vm755_vm11, %v661_v48, %v819_v63  ;;  %v1828_v43 = vpack.c.bf16 %v1151_v42, %v1150_v58  ;;  %v1153_v48 = vld [vmem:[%s2536_s8 + $0x28] sm:$0xff]  ;;  %v1155_v62 = vld [vmem:[%s2536_s8 + $0x38] sm:$0xff] }
 0x158   :  { %vm758_vm12 = vcmp.ge.f32.partialorder %v676_v51, 0.0  ;;  %v822_v29 = vmul.f32 0.01, %v676_v51  ;;  %v1799_v7 = vpack.c.bf16 %v884_v55, %v883_v5  ;;  %v1831_v20 = vpack.c.bf16 %v1153_v48, %v1152_v44  ;;  %v1123_v5 = vld [vmem:[%s2537_s6] sm:$0x3] }
 0x159   :  { %vm757_vm13 = vcmp.ge.f32.partialorder %v671_v9, 0.0  ;;  %v821_v13 = vmul.f32 0.01, %v671_v9  ;;  %v1686_v61 = vpop.f32.mrb[60].mxu0  ;;  %v1834_v63 = vpack.c.bf16 %v1155_v62, %v1154_v25 }
 0x15a   :  { %v686_v19 = vadd.f32 %v1686_v61, %v2206_v8  ;;  %v680_v23 = vpop.f32.mrb[61].mxu0  ;;  %1800 = vmatprep.subr.bf16.mxu1 %v1799_v7  ;;  %v886_v22 = vsel %vm758_vm12, %v676_v51, %v822_v29  ;;  %v1130_v51 = vshrl.u32 %v1129_v3, 7 }
 0x15b   :  { %v681_v0 = vadd.f32 %v2206_v8, %v680_v23  ;;  %1802 = vmatpush3.bf16.msra.mxu1 %v1801_v32  ;;  %v885_v15 = vsel %vm757_vm13, %v671_v9, %v821_v13  ;;  %v1414_v13 = vld [vmem:[%s2538_s7] ss:$0 sm:$0xff] }
 0x15c   :  { %vm760_vm14 = vcmp.ge.f32.partialorder %v686_v19, 0.0  ;;  %v824_v38 = vmul.f32 0.01, %v686_v19  ;;  %v1803_v17 = vpack.c.bf16 %v886_v22, %v885_v15  ;;  %v1131_v55 = vsub.s32 0, %v1130_v51 }
 0x15d   :  { %vm759_vm15 = vcmp.ge.f32.partialorder %v681_v0, 0.0  ;;  %v823_v2 = vmul.f32 0.01, %v681_v0  ;;  %v1689_v4 = vpop.f32.mrb[62].mxu0  ;;  %v1141_v9 = vsub.s32 1, %v1130_v51 }
 0x15e   :  { %v696_v6 = vadd.f32 %v1689_v4, %v2206_v8  ;;  %v690_v27 = vpop.f32.mrb[63].mxu0  ;;  %1804 = vmatprep.subr.bf16.mxu1 %v1803_v17  ;;  %v888_v31 = vsel %vm760_vm14, %v686_v19, %v824_v38  ;;  %v1132_v29 = vrot.slane %v1123_v5, %v1131_v55  ;;  %v1240_v17 = vld [vmem:[%s2539_s10] sm:$0xff] }
 0x15f   :  { %v691_v10 = vadd.f32 %v2206_v8, %v690_v27  ;;  %1806 = vmatpush3.bf16.msra.mxu1 %v1805_v41  ;;  %v887_v28 = vsel %vm759_vm15, %v681_v0, %v823_v2  ;;  %v893_v8 = vld [vmem:[%s2532_s2 + $0x10] sm:$0xff]  ;;  %v1036_v41 = vld [vmem:[%s2534_s5 + $0x8] sm:$0xff]  ;;  %v1142_v7 = vrot.slane %v1123_v5, %v1141_v9 }
 0x160   :  { %vm762_vm0 = vcmp.ge.f32.partialorder %v696_v6, 0.0  ;;  %v826_v47 = vmul.f32 0.01, %v696_v6  ;;  %v1807_v32 = vpack.c.bf16 %v888_v31, %v887_v28  ;;  %v1816_v1 = vpack.c.bf16 %v1036_v41, %v1035_v56  ;;  %v1241_v2 = vld [vmem:[%s2539_s10 + $0x8] sm:$0xff]  ;;  %v1242_v31 = vld [vmem:[%s2539_s10 + $0x10] sm:$0xff] }
 0x161   :  { %vm761_vm1 = vcmp.ge.f32.partialorder %v691_v10, 0.0  ;;  %v825_v12 = vmul.f32 0.01, %v691_v10  ;;  %v1837_v27 = vpack.c.bf16 %v1241_v2, %v1240_v17  ;;  %v1416_v56 = vld [vmem:[%s2540_s9] ss:$0 sm:$0xff] }
 0x162   :  { %1808 = vmatprep.subr.bf16.mxu1 %v1807_v32  ;;  %v890_v14 = vsel %vm762_vm0, %v696_v6, %v826_v47  ;;  %v1244_v32 = vld [vmem:[%s2539_s10 + $0x20] sm:$0xff] }
 0x163   :  { %1810 = vmatpush3.bf16.msra.mxu1 %v1809_v50  ;;  %v889_v16 = vsel %vm761_vm1, %v691_v10, %v825_v12  ;;  %v1038_v50 = vld [vmem:[%s2534_s5 + $0x18] sm:$0xff]  ;;  %v1245_v12 = vld [vmem:[%s2539_s10 + $0x28] sm:$0xff] }
 0x164   :  { %v1811_v36 = vpack.c.bf16 %v890_v14, %v889_v16  ;;  %v1819_v59 = vpack.c.bf16 %v1038_v50, %v1037_v46  ;;  %v1243_v10 = vld [vmem:[%s2539_s10 + $0x18] sm:$0xff]  ;;  %v1843_v14 = vpack.c.bf16 %v1245_v12, %v1244_v32  ;;  %v1246_v16 = vld [vmem:[%s2539_s10 + $0x30] sm:$0xff] }
 0x165   :  { %v1840_v47 = vpack.c.bf16 %v1243_v10, %v1242_v31 }
 0x166   :  { %1812 = vmatprep.subr.bf16.mxu1 %v1811_v36  ;;  %v1247_v36 = vld [vmem:[%s2539_s10 + $0x38] sm:$0xff] }
 0x167   :  { %1814 = vmatpush3.bf16.msra.mxu1 %v1813_v18  ;;  %v1040_v18 = vld [vmem:[%s2534_s5 + $0x28] sm:$0xff] }
 0x168   :  { %1815 = vmatprep.subr.bf16.mxu1 %v1859_v37  ;;  %v1822_v40 = vpack.c.bf16 %v1040_v18, %v1039_v60 }
 0x16a   :  { %1030 = vmatmul.mubr.f32.vlgmr.msra.gmra.mrb[2].mxu1 %v893_v8  ;;  %v1846_v8 = vpack.c.bf16 %v1247_v36, %v1246_v16 }
 0x16b   :  { %1817 = vmatpush3.bf16.msra.mxu1 %v1816_v1  ;;  %1702 = vmatprep.mubr.msk.f32.mxu1 %vm1860_vm2, %v1861_v21 }
 0x16c   :  { %1818 = vmatprep.subr.bf16.mxu1 %v1859_v37 }
 0x16f   :  { %1820 = vmatpush3.bf16.msra.mxu1 %v1819_v59  ;;  %v1418_v59 = vld [vmem:[%s2541_s11] ss:$0 sm:$0xff] }
 0x170   :  { %1821 = vmatprep.subr.bf16.mxu1 %v1859_v37 }
 0x173   :  { %1823 = vmatpush3.bf16.msra.mxu1 %v1822_v40 }
 0x174   :  { %1824 = vmatprep.subr.bf16.mxu1 %v1859_v37 }
 0x1ce   :  { %v1127_v53 = vpop.permute.xlu0 %1126 }
 0x1cf   :  { %v1133_v23 = vmul.f32 %v1132_v29, %v1127_v53 }
 0x1d3   :  { %v1137_v61 = vpop.permute.xlu0 %1136 }
 0x1d4   :  { %v1143_v15 = vmul.f32 %v1142_v7, %v1137_v61 }
 0x1fd   :  { %v1521_v45 = vpop.f32.mrb[0].mxu1 }
 0x1fe   :  { %v1522_v49 = vpop.f32.mrb[1].mxu1 }
 0x1ff   :  { %v1523_v33 = vadd.f32 %v1522_v49, %v1521_v45  ;;  %v1329_v49 = vand.u32 127, %v1129_v3 }
 0x201   :  { %vm1339_vm7 = vcmp.eq.s32.totalorder %v1329_v49, 2  ;;  %vm1340_vm8 = vcmp.eq.s32.totalorder %v1329_v49, 5 }
 0x202   :  { %vm1341_vm9 = vmor %vm1339_vm7, %vm1340_vm8 }
 0x23d   :  { %v1556_v34 = vpop.f32.mrb[2].mxu1 }
 0x23e   :  { %v1557_v52 = vpop.f32.mrb[3].mxu1 }
 0x23f   :  { %v1558_v57 = vadd.f32 %v1557_v52, %v1556_v34 }
 0x241   :  { %v1032_v54 = vadd.f32 %v1558_v57, %v1523_v33 }
 0x243   :  { %1703 = vmatmul.mubr.msk.f32.vlgmr.msra.gmra.mrb[4].mxu1 %vm1048_vm3, %v1032_v54 }
 0x244   :  { %1826 = vmatpush3.bf16.msra.mxu1 %v1825_v11  ;;  %1721 = vmatprep.mubr.msk.f32.mxu1 %vm1860_vm2, %v1861_v21 }
 0x245   :  { %1827 = vmatprep.subr.bf16.mxu1 %v1859_v37 }
 0x248   :  { %1829 = vmatpush3.bf16.msra.mxu1 %v1828_v43 }
 0x249   :  { %1830 = vmatprep.subr.bf16.mxu1 %v1859_v37 }
 0x24c   :  { %1832 = vmatpush3.bf16.msra.mxu1 %v1831_v20 }
 0x24d   :  { %1833 = vmatprep.subr.bf16.mxu1 %v1859_v37 }
 0x250   :  { %1835 = vmatpush3.bf16.msra.mxu1 %v1834_v63 }
 0x251   :  { %1836 = vmatprep.subr.bf16.mxu1 %v1859_v37 }
 0x316   :  { %v1118_v19 = vpop.f32.mrb[4].mxu1 }
 0x317   :  { %v1119_v22 = vadd.f32 %v1414_v13, %v1118_v19  ;;  %v1704_v0 = vpop.f32.mrb[5].mxu1 }
 0x319   :  { %v1134_v38 = vadd.f32 %v1133_v23, %v1119_v22 }
 0x31b   :  { %v1144_v4 = vadd.f32 %v1143_v15, %v1134_v38 }
 0x31d   :  { %vm1145_vm4 = vcmp.ge.f32.partialorder %v1144_v4, 0.0  ;;  %v1146_v6 = vmul.f32 0.01, %v1144_v4 }
 0x31f   :  { %v1147_v28 = vsel %vm1145_vm4, %v1144_v4, %v1146_v6 }
 0x320   :  { %1722 = vmatmul.mubr.msk.f32.vlgmr.msra.gmra.mrb[6].mxu1 %vm1163_vm5, %v1147_v28 }
 0x321   :  { %1838 = vmatpush3.bf16.msra.mxu1 %v1837_v27  ;;  %1740 = vmatprep.mubr.msk.f32.mxu1 %vm1860_vm2, %v1861_v21 }
 0x322   :  { %1839 = vmatprep.subr.bf16.mxu1 %v1859_v37 }
 0x325   :  { %1841 = vmatpush3.bf16.msra.mxu1 %v1840_v47 }
 0x326   :  { %1842 = vmatprep.subr.bf16.mxu1 %v1859_v37 }
 0x329   :  { %1844 = vmatpush3.bf16.msra.mxu1 %v1843_v14 }
 0x32a   :  { %1845 = vmatprep.subr.bf16.mxu1 %v1859_v37 }
 0x32d   :  { %1847 = vmatpush3.bf16.msra.mxu1 %v1846_v8 }
 0x3f3   :  { %v1233_v41 = vpop.f32.mrb[6].mxu1 }
 0x3f4   :  { %v1234_v46 = vadd.f32 %v1416_v56, %v1233_v41  ;;  %v1723_v1 = vpop.f32.mrb[7].mxu1 }
 0x3f6   :  { %vm1237_vm6 = vcmp.ge.f32.partialorder %v1234_v46, 0.0  ;;  %v1238_v50 = vmul.f32 0.01, %v1234_v46 }
 0x3f8   :  { %v1239_v37 = vsel %vm1237_vm6, %v1234_v46, %v1238_v50 }
 0x3f9   :  { %1741 = vmatmul.mubr.msk.f32.vlgmr.msra.gmra.mrb[8].mxu1 %vm1163_vm5, %v1239_v37 }
 0x4cc   :  { %v1324_v60 = vpop.f32.mrb[8].mxu1 }
 0x4cd   :  { %v1325_v18 = vadd.f32 %v1418_v59, %v1324_v60  ;;  %v1742_v40 = vpop.f32.mrb[9].mxu1 }
 0x4cf   :  { %v1331_v21 = vand.u32 2147483647, %v1325_v18  ;;  %v1330_v34 = vmax.f32 %v1325_v18, 0.0 }
 0x4d1   :  { %v1332_v24 = vsub.f32 0.0, %v1331_v21 }
 0x4d3   :  { %v1333_v26 = vmul.f32 1.442695, %v1332_v24 }
 0x4d5   :  { %1855 = vpow2.f32 %v1333_v26 }
 0x4df   :  { %v1856_v30 = vpop.eup %1855 }
 0x4e0   :  { %v1335_v45 = vadd.f32 1.0, %v1856_v30 }
 0x4e2   :  { %1857 = vlog2.f32 %v1335_v45 }
 0x4ec   :  { %v1858_v33 = vpop.eup %1857 }
 0x4ed   :  { %v1337_v35 = vmul.f32 0.6931472, %v1858_v33 }
 0x4ef   :  { %v1338_v39 = vadd.f32 %v1337_v35, %v1330_v34 }
 0x4f1   :  { %v1342_v52 = vsel %vm1341_vm9, %v1338_v39, %v1325_v18 }
 0x4f2   :  { %1343 = vst [vmem:[%s2542_s12] sm:$0xff] %v1342_v52 }

</bundles_post_ra>
